<compile_context>
chip_gen: v5e
topology: v5e:2x2
jax: 0.10.0
libtpu: 0.0.40
codegen_flags: <defaults>
</compile_context>

<pallas_src>
import jax
import jax.numpy as jnp
from jax.experimental import pallas as pl
from jax.experimental.pallas import tpu as pltpu

_EPS = 1e-10  # reference's epsilon clamp, applied exactly as log(p + 1e-10)


def _gather_cls_logits(hid_first_hbm, hid_last_hbm, w_ref, scalars_ref,
                       cls_ref, buf_first, buf_last, sem):
    """Shared head body: CLS-row DMA, cls add, fc matvec.

    Returns (logits (B,1) f32, iterative loss weight scalar).
    """
    # ---- Fused CLS-row gather: strided HBM->VMEM DMA of only the s=0 row,
    #      in the encoder's native dtype, into flat (B, H) buffers.
    cp0 = pltpu.make_async_copy(hid_first_hbm.at[:, 0, :], buf_first, sem.at[0])
    cp1 = pltpu.make_async_copy(hid_last_hbm.at[:, 0, :], buf_last, sem.at[1])
    cp0.start()
    cp1.start()

    # Read SMEM scalars before the waits (waits break SMEM sst->sld forwarding).
    bias = scalars_ref[0]
    loss_w = scalars_ref[1]

    cp0.wait()
    cp1.wait()

    # cls = cls_first + cls_last (f32 accumulate; v5e has no bf16 VPU/EUP).
    cls_f32 = (buf_first[...].astype(jnp.float32)
               + buf_last[...].astype(jnp.float32))                 # (B, H)
    cls_ref[...] = cls_f32.astype(cls_ref.dtype)

    # ---- fc(cls): lane-major (1, H) weight broadcast over B sublanes.
    #      VPU multiply + XLU lane reduce instead of an N=1 MXU matvec.
    logits = jnp.sum(cls_f32 * w_ref[...].astype(jnp.float32),
                     axis=-1, keepdims=True) + bias                 # (B, 1)
    return logits, loss_w


def _head_kernel_train(hid_first_hbm, hid_last_hbm, w_ref, labels_ref,
                       scalars_ref, loss_ref, prob_ref, cls_ref,
                       buf_first, buf_last, sem):
    logits, loss_w = _gather_cls_logits(hid_first_hbm, hid_last_hbm, w_ref,
                                        scalars_ref, cls_ref,
                                        buf_first, buf_last, sem)
    prob = jax.nn.sigmoid(logits)                                   # (B, 1)
    prob_ref[...] = prob

    # Reference-exact weighted BCE: log(p + 1e-10), log(1-p + 1e-10) in f32.
    labels = labels_ref[...]                                        # (B, 1)
    log_p = jnp.log(prob + _EPS)
    log_1mp = jnp.log((1.0 - prob) + _EPS)
    loss_vec = (log_p * labels + log_1mp * (1.0 - labels)) * loss_w
    loss_ref[0] = -jnp.mean(loss_vec)


def _head_kernel_infer(hid_first_hbm, hid_last_hbm, w_ref, scalars_ref,
                       prob_ref, cls_ref, buf_first, buf_last, sem):
    logits, _ = _gather_cls_logits(hid_first_hbm, hid_last_hbm, w_ref,
                                   scalars_ref, cls_ref,
                                   buf_first, buf_last, sem)
    prob_ref[...] = jax.nn.sigmoid(logits)


def model_forward(hidden_first, hidden_last, fc_w, fc_b, labels=None,
                  epochs_now=None, epoch_max=None, train_type=None):
    """hidden_first/hidden_last: (B, S, H) encoder hidden states (any float
    dtype); fc_w: (1, H); fc_b: (1,); labels: (B,) or None.
    Returns (loss, prob, cls) if labels given, else (prob, cls)."""
    B, S, H = hidden_first.shape
    hdtype = hidden_first.dtype
    hbytes = jnp.dtype(hdtype).itemsize

    w_row = fc_w.astype(jnp.float32).reshape(1, H)                  # lane-major

    # Iterative-training weight as a traced scalar (no retrace per epoch).
    if train_type == 'do_train_iterative':
        weight = 1.0 - (jnp.asarray(epochs_now, jnp.float32)
                        / (jnp.asarray(epoch_max, jnp.float32) + 1.0))
    else:
        weight = jnp.float32(1.0)
    scalars = jnp.stack([fc_b.astype(jnp.float32).reshape(()),
                         jnp.asarray(weight, jnp.float32)])         # SMEM (2,)

    have_labels = labels is not None

    # Shared specs / scratch.
    hbm_spec = pl.BlockSpec(memory_space=pl.ANY)
    vmem_spec = pl.BlockSpec(memory_space=pltpu.VMEM)
    smem_spec = pl.BlockSpec(memory_space=pltpu.SMEM)
    scratch_shapes = [
        pltpu.VMEM((B, H), hdtype),                                 # CLS row buf 0
        pltpu.VMEM((B, H), hdtype),                                 # CLS row buf 1
        pltpu.SemaphoreType.DMA((2,)),
    ]

    # Advisory cost estimate: kernel is dispatch/DMA-latency bound; this lets
    # XLA overlap surrounding encoder ops with the tiny custom call.
    bytes_accessed = int(2 * B * H * hbytes        # CLS row reads
                         + B * H * hbytes          # cls write
                         + H * 4                   # fc weight
                         + B * 4 * (3 if have_labels else 1)
                         + 16)
    flops = int(3 * B * H + 16 * B)
    transcendentals = int((4 if have_labels else 2) * B)
    cost = pl.CostEstimate(flops=flops, transcendentals=transcendentals,
                           bytes_accessed=bytes_accessed)

    if have_labels:
        labels_col = labels.astype(jnp.float32).reshape(B, 1)
        loss, prob, cls = pl.pallas_call(
            _head_kernel_train,
            out_shape=(
                jax.ShapeDtypeStruct((1,), jnp.float32),            # loss
                jax.ShapeDtypeStruct((B, 1), jnp.float32),          # prob
                jax.ShapeDtypeStruct((B, H), hdtype),               # cls
            ),
            in_specs=[hbm_spec, hbm_spec, vmem_spec, vmem_spec, smem_spec],
            out_specs=(smem_spec, vmem_spec, vmem_spec),
            scratch_shapes=scratch_shapes,
            cost_estimate=cost,
        )(hidden_first, hidden_last, w_row, labels_col, scalars)
        return loss[0], prob, cls

    prob, cls = pl.pallas_call(
        _head_kernel_infer,
        out_shape=(
            jax.ShapeDtypeStruct((B, 1), jnp.float32),              # prob
            jax.ShapeDtypeStruct((B, H), hdtype),                   # cls
        ),
        in_specs=[hbm_spec, hbm_spec, vmem_spec, smem_spec],
        out_specs=(vmem_spec, vmem_spec),
        scratch_shapes=scratch_shapes,
        cost_estimate=cost,
    )(hidden_first, hidden_last, w_row, scalars)
    return prob, cls


if __name__ == "__main__":
    B, S, H = 8, 8, 768  # fc is nn.Linear(1*768, 1) -> hidden must be 768

    key = jax.random.PRNGKey(0)
    k1, k2, k3, k4, k5 = jax.random.split(key, 5)

    # Stand-ins for encoder.hidden_states[1] and hidden_states[-1]
    hidden_first = jax.random.normal(k1, (B, S, H), dtype=jnp.float32) * 0.1
    hidden_last = jax.random.normal(k2, (B, S, H), dtype=jnp.float32) * 0.1

    # Deterministic fc params (nn.Linear(768, 1)): weight (1, 768), bias (1,)
    fc_w = jax.random.normal(k3, (1, H), dtype=jnp.float32) * 0.02
    fc_b = jax.random.normal(k4, (1,), dtype=jnp.float32) * 0.02

    labels = (jax.random.uniform(k5, (B,)) > 0.5).astype(jnp.float32)

    # --- Training path (labels given) ---
    loss, prob, cls = model_forward(
        hidden_first, hidden_last, fc_w, fc_b, labels,
        epochs_now=2, epoch_max=10, train_type='do_train_iterative')
    jax.block_until_ready((loss, prob, cls))

    # Pure-JAX reference check (original formulation)
    cls_ref = hidden_first[:, 0, :] + hidden_last[:, 0, :]
    logits_ref = cls_ref @ fc_w.T + fc_b
    prob_ref = jax.nn.sigmoid(logits_ref)
    w_ref = 1.0 - (2.0 / 11.0)
    lv = (jnp.log(prob_ref[:, 0] + 1e-10) * labels
          + jnp.log(1.0 - prob_ref[:, 0] + 1e-10) * (1.0 - labels)) * w_ref
    loss_ref = -lv.mean()
    assert jnp.allclose(prob, prob_ref, atol=1e-5), "prob mismatch"
    assert jnp.allclose(cls, cls_ref, atol=1e-5), "cls mismatch"
    assert jnp.allclose(loss, loss_ref, atol=1e-5), "loss mismatch"

    # --- Inference path (labels=None): compiles the loss-free kernel variant ---
    prob_i, cls_i = model_forward(hidden_first, hidden_last, fc_w, fc_b)
    jax.block_until_ready((prob_i, cls_i))
    assert jnp.allclose(prob_i, prob_ref, atol=1e-5), "infer prob mismatch"
    assert jnp.allclose(cls_i, cls_ref, atol=1e-5), "infer cls mismatch"

    print("KERNEL_OK")
</pallas_src>

<mosaic_0001>
module attributes {stable_mosaic.version = 11 : i64} {
  func.func @_head_kernel_train(%arg0: memref<8x8x768xf32, #tpu.memory_space<any>>, %arg1: memref<8x8x768xf32, #tpu.memory_space<any>>, %arg2: memref<1x768xf32, #tpu.memory_space<vmem>>, %arg3: memref<8x1xf32, #tpu.memory_space<vmem>>, %arg4: memref<2xf32, #tpu.memory_space<smem>>, %arg5: memref<1xf32, #tpu.memory_space<smem>>, %arg6: memref<8x1xf32, #tpu.memory_space<vmem>>, %arg7: memref<8x768xf32, #tpu.memory_space<vmem>>, %arg8: memref<8x768xf32, #tpu.memory_space<vmem>>, %arg9: memref<8x768xf32, #tpu.memory_space<vmem>>, %arg10: memref<2x!tpu.dma_semaphore, #tpu.memory_space<semaphore_mem>>) attributes {dimension_semantics = [], scalar_prefetch = 0 : i64, scratch_operands = 3 : i64, tpu.core_type = #tpu.core_type<tc>} {
    %c0_i32 = arith.constant 0 : i32
    %c0_i32_0 = arith.constant 0 : i32
    %c0_i32_1 = arith.constant 0 : i32
    %c0_i32_2 = arith.constant 0 : i32
    %0 = tpu.memref_slice %arg0[%c0_i32_1, %c0_i32, %c0_i32_2] : memref<8x8x768xf32, #tpu.memory_space<any>> -> memref<8x1x768xf32, #tpu.memory_space<any>>
    %1 = tpu.memref_squeeze %0 : memref<8x1x768xf32, #tpu.memory_space<any>> -> memref<8x768xf32, #tpu.memory_space<any>>
    %2 = tpu.memref_slice %arg10[%c0_i32_0] : memref<2x!tpu.dma_semaphore, #tpu.memory_space<semaphore_mem>> -> memref<1x!tpu.dma_semaphore, #tpu.memory_space<semaphore_mem>>
    %3 = tpu.memref_squeeze %2 : memref<1x!tpu.dma_semaphore, #tpu.memory_space<semaphore_mem>> -> memref<!tpu.dma_semaphore, #tpu.memory_space<semaphore_mem>>
    tpu.enqueue_dma source(%1 : memref<8x768xf32, #tpu.memory_space<any>>) target(%arg8 : memref<8x768xf32, #tpu.memory_space<vmem>>) target_semaphore(%3 : memref<!tpu.dma_semaphore, #tpu.memory_space<semaphore_mem>>)
    %c0_i32_3 = arith.constant 0 : i32
    %c1_i32 = arith.constant 1 : i32
    %c0_i32_4 = arith.constant 0 : i32
    %c0_i32_5 = arith.constant 0 : i32
    %4 = tpu.memref_slice %arg1[%c0_i32_4, %c0_i32_3, %c0_i32_5] : memref<8x8x768xf32, #tpu.memory_space<any>> -> memref<8x1x768xf32, #tpu.memory_space<any>>
    %5 = tpu.memref_squeeze %4 : memref<8x1x768xf32, #tpu.memory_space<any>> -> memref<8x768xf32, #tpu.memory_space<any>>
    %6 = tpu.memref_slice %arg10[%c1_i32] : memref<2x!tpu.dma_semaphore, #tpu.memory_space<semaphore_mem>> -> memref<1x!tpu.dma_semaphore, #tpu.memory_space<semaphore_mem>>
    %7 = tpu.memref_squeeze %6 : memref<1x!tpu.dma_semaphore, #tpu.memory_space<semaphore_mem>> -> memref<!tpu.dma_semaphore, #tpu.memory_space<semaphore_mem>>
    tpu.enqueue_dma source(%5 : memref<8x768xf32, #tpu.memory_space<any>>) target(%arg9 : memref<8x768xf32, #tpu.memory_space<vmem>>) target_semaphore(%7 : memref<!tpu.dma_semaphore, #tpu.memory_space<semaphore_mem>>)
    %c0 = arith.constant 0 : index
    %8 = memref.load %arg4[%c0] : memref<2xf32, #tpu.memory_space<smem>>
    %c1 = arith.constant 1 : index
    %9 = memref.load %arg4[%c1] : memref<2xf32, #tpu.memory_space<smem>>
    %c0_i32_6 = arith.constant 0 : i32
    %c0_i32_7 = arith.constant 0 : i32
    %c0_i32_8 = arith.constant 0 : i32
    %c0_i32_9 = arith.constant 0 : i32
    %10 = tpu.memref_slice %arg0[%c0_i32_8, %c0_i32_6, %c0_i32_9] : memref<8x8x768xf32, #tpu.memory_space<any>> -> memref<8x1x768xf32, #tpu.memory_space<any>>
    %11 = tpu.memref_squeeze %10 : memref<8x1x768xf32, #tpu.memory_space<any>> -> memref<8x768xf32, #tpu.memory_space<any>>
    %12 = tpu.memref_slice %arg10[%c0_i32_7] : memref<2x!tpu.dma_semaphore, #tpu.memory_space<semaphore_mem>> -> memref<1x!tpu.dma_semaphore, #tpu.memory_space<semaphore_mem>>
    %13 = tpu.memref_squeeze %12 : memref<1x!tpu.dma_semaphore, #tpu.memory_space<semaphore_mem>> -> memref<!tpu.dma_semaphore, #tpu.memory_space<semaphore_mem>>
    tpu.wait_dma2 semaphore(%13 : memref<!tpu.dma_semaphore, #tpu.memory_space<semaphore_mem>>) src(%11 : memref<8x768xf32, #tpu.memory_space<any>>) dst(%arg8 : memref<8x768xf32, #tpu.memory_space<vmem>>)
    %c0_i32_10 = arith.constant 0 : i32
    %c1_i32_11 = arith.constant 1 : i32
    %c0_i32_12 = arith.constant 0 : i32
    %c0_i32_13 = arith.constant 0 : i32
    %14 = tpu.memref_slice %arg1[%c0_i32_12, %c0_i32_10, %c0_i32_13] : memref<8x8x768xf32, #tpu.memory_space<any>> -> memref<8x1x768xf32, #tpu.memory_space<any>>
    %15 = tpu.memref_squeeze %14 : memref<8x1x768xf32, #tpu.memory_space<any>> -> memref<8x768xf32, #tpu.memory_space<any>>
    %16 = tpu.memref_slice %arg10[%c1_i32_11] : memref<2x!tpu.dma_semaphore, #tpu.memory_space<semaphore_mem>> -> memref<1x!tpu.dma_semaphore, #tpu.memory_space<semaphore_mem>>
    %17 = tpu.memref_squeeze %16 : memref<1x!tpu.dma_semaphore, #tpu.memory_space<semaphore_mem>> -> memref<!tpu.dma_semaphore, #tpu.memory_space<semaphore_mem>>
    tpu.wait_dma2 semaphore(%17 : memref<!tpu.dma_semaphore, #tpu.memory_space<semaphore_mem>>) src(%15 : memref<8x768xf32, #tpu.memory_space<any>>) dst(%arg9 : memref<8x768xf32, #tpu.memory_space<vmem>>)
    %c0_14 = arith.constant 0 : index
    %c0_15 = arith.constant 0 : index
    %18 = vector.load %arg8[%c0_14, %c0_15] : memref<8x768xf32, #tpu.memory_space<vmem>>, vector<8x768xf32>
    %c0_16 = arith.constant 0 : index
    %c0_17 = arith.constant 0 : index
    %19 = vector.load %arg9[%c0_16, %c0_17] : memref<8x768xf32, #tpu.memory_space<vmem>>, vector<8x768xf32>
    %20 = arith.addf %18, %19 : vector<8x768xf32>
    %c0_18 = arith.constant 0 : index
    %c0_19 = arith.constant 0 : index
    %21 = vector.load %arg7[%c0_18, %c0_19] : memref<8x768xf32, #tpu.memory_space<vmem>>, vector<8x768xf32>
    tpu.vector_store %arg7[%c0_18, %c0_19], %20 {strides = array<i32>} : memref<8x768xf32, #tpu.memory_space<vmem>>, vector<8x768xf32>,
    %c0_20 = arith.constant 0 : index
    %c0_21 = arith.constant 0 : index
    %22 = vector.load %arg2[%c0_20, %c0_21] : memref<1x768xf32, #tpu.memory_space<vmem>>, vector<1x768xf32>
    %23 = vector.broadcast %22 : vector<1x768xf32> to vector<8x768xf32>
    %24 = arith.mulf %20, %23 : vector<8x768xf32>
    %cst = arith.constant dense<0.000000e+00> : vector<8xf32>
    %25 = vector.multi_reduction <add>, %24, %cst [1] : vector<8x768xf32> to vector<8xf32>
    %26 = vector.shape_cast %25 : vector<8xf32> to vector<8x1xf32>
    %27 = vector.broadcast %8 : f32 to vector<8x1xf32>
    %28 = arith.addf %26, %27 : vector<8x1xf32>
    %29 = arith.negf %28 : vector<8x1xf32>
    %30 = math.exp %29 : vector<8x1xf32>
    %cst_22 = arith.constant 1.000000e+00 : f32
    %31 = vector.broadcast %cst_22 : f32 to vector<8x1xf32>
    %32 = arith.addf %31, %30 : vector<8x1xf32>
    %33 = arith.divf %31, %32 : vector<8x1xf32>
    %c0_23 = arith.constant 0 : index
    %c0_24 = arith.constant 0 : index
    %34 = vector.load %arg6[%c0_23, %c0_24] : memref<8x1xf32, #tpu.memory_space<vmem>>, vector<8x1xf32>
    tpu.vector_store %arg6[%c0_23, %c0_24], %33 {strides = array<i32>} : memref<8x1xf32, #tpu.memory_space<vmem>>, vector<8x1xf32>,
    %c0_25 = arith.constant 0 : index
    %c0_26 = arith.constant 0 : index
    %35 = vector.load %arg3[%c0_25, %c0_26] : memref<8x1xf32, #tpu.memory_space<vmem>>, vector<8x1xf32>
    %cst_27 = arith.constant 1.000000e-10 : f32
    %36 = vector.broadcast %cst_27 : f32 to vector<8x1xf32>
    %37 = arith.addf %33, %36 : vector<8x1xf32>
    %38 = math.log %37 : vector<8x1xf32>
    %cst_28 = arith.constant 1.000000e+00 : f32
    %39 = vector.broadcast %cst_28 : f32 to vector<8x1xf32>
    %40 = arith.subf %39, %33 : vector<8x1xf32>
    %cst_29 = arith.constant 1.000000e-10 : f32
    %41 = vector.broadcast %cst_29 : f32 to vector<8x1xf32>
    %42 = arith.addf %40, %41 : vector<8x1xf32>
    %43 = math.log %42 : vector<8x1xf32>
    %44 = arith.mulf %38, %35 : vector<8x1xf32>
    %cst_30 = arith.constant 1.000000e+00 : f32
    %45 = vector.broadcast %cst_30 : f32 to vector<8x1xf32>
    %46 = arith.subf %45, %35 : vector<8x1xf32>
    %47 = arith.mulf %43, %46 : vector<8x1xf32>
    %48 = arith.addf %44, %47 : vector<8x1xf32>
    %49 = vector.broadcast %9 : f32 to vector<8x1xf32>
    %50 = arith.mulf %48, %49 : vector<8x1xf32>
    %51 = vector.shape_cast %50 : vector<8x1xf32> to vector<1x8x1xf32>
    %cst_31 = arith.constant dense<0.000000e+00> : vector<1xf32>
    %52 = vector.multi_reduction <add>, %51, %cst_31 [1, 2] : vector<1x8x1xf32> to vector<1xf32>
    %53 = vector.shape_cast %52 : vector<1xf32> to vector<1x1x1xf32>
    %54 = vector.extract %53[0, 0, 0] : f32 from vector<1x1x1xf32>
    %cst_32 = arith.constant 8.000000e+00 : f32
    %55 = arith.divf %54, %cst_32 : f32
    %cst_33 = arith.constant 0.000000e+00 : f32
    %56 = arith.subf %cst_33, %55 : f32
    %c0_34 = arith.constant 0 : index
    %57 = memref.load %arg5[%c0_34] : memref<1xf32, #tpu.memory_space<smem>>
    memref.store %56, %arg5[%c0_34] : memref<1xf32, #tpu.memory_space<smem>>
    return
  }
}

</mosaic_0001>

<bundles_post_ra>
// kernel: tpu_custom_call.1
= control target key start
LH: loop header
LB: loop body
LE: loop exit
PB: predicated region body
PF: predicated region fallthrough
CT: control target
= control target key end

     0   :  { %13 = vsyncpa [#allocation8], 0  ;;  %s450_s0 = inlined_call_operand.hbm [shape: f32[8,8,768], index: 0, kind: input, shape index: {}]   ;;  %s451_s1 = inlined_call_operand.hbm [shape: f32[8,8,768], index: 1, kind: input, shape index: {}]   ;;  %s452_s2 = inlined_call_operand.vmem [shape: f32[1,768], index: 2, kind: input, shape index: {}]   ;;  %s453_s3 = inlined_call_operand.vmem [shape: f32[8,1], index: 3, kind: input, shape index: {}]   ;;  %s454_s4 = inlined_call_operand.vmem [shape: f32[2], index: 4, kind: input, shape index: {}]   ;;  %s455_s5 = inlined_call_operand.hbm [shape: f32[1], index: 5, kind: output, shape index: {0}]   ;;  %s456_s6 = inlined_call_operand.vmem [shape: f32[8,1], index: 6, kind: output, shape index: {1}]   ;;  %s457_s7 = inlined_call_operand.hbm [shape: f32[8,768], index: 7, kind: output, shape index: {2}]  }
   0x1   :  { %14 = vsyncpa [#allocation7], 0 }
   0x2   :  { %15 = vsyncpa [#allocation6], 0  ;;  %s25_s26 = sshll.u32 %s454_s4, 4  ;;  %s363_s27 = smov [#allocation5]   ;;  %s26_s26 = int_to_ptr.vmem [resolvable:$true] %s25_s26 }
   0x3   :  { %28 = dma.vmem_to_smem %s26_s26, 16, %s363_s27, [#allocation8]  }
   0x4   :  { %353 = dma.done.wait [#allocation8], 16  }
   0x5   :  { %354 = vsyncadd [#allocation8], 4294967280 }
   0x6   :  { %33 = sfence }
   0x7   :  { %s38_s28 = sld [smem:[#allocation0]]   ;;  %s46_s8 = sshll.u32 %s450_s0, 4  ;;  %s47_s8 = int_to_ptr.hbm [resolvable:$true] %s46_s8 }
   0x8   :  { %s364_s9 = smov [#allocation2]   ;;  %s365_s11 = smov 128  }
   0x9   :  { %s48_s10 = sshll.u32 %s364_s9, 4  ;;  %55 = sst [smem:[#allocation12]] %s365_s11  ;;  %s49_s10 = int_to_ptr.vmem [resolvable:$true] %s48_s10 }
   0xa   :  { %57 = sst [smem:[#allocation12 + $0x1]] %s365_s11  ;;  %s366_s12 = smov 8  }
   0xb   :  { %59 = sst [smem:[#allocation12 + $0x2]] %s366_s12  ;;  %s367_s13 = smov 768  }
   0xc   :  { %61 = sst [smem:[#allocation12 + $0x3]] %s367_s13  ;;  %s368_s15 = smov 16  }
   0xd   :  { %s268_s4 = sshll.u32 %s38_s28, 26  ;;  %63 = sst [smem:[#allocation12 + $0x4]] %s368_s15 }
   0xe   :  { %s269_s14 = sadd.s32 134217728, %s268_s4  ;;  %s369_s16 = smov 1  }
   0xf   :  { %65 = sst [smem:[#allocation12 + $0x5]] %s369_s16  ;;  %s80_s0 = sshll.u32 %s451_s1, 4  ;;  %s81_s0 = int_to_ptr.hbm [resolvable:$true] %s80_s0 }
  0x10   :  { %s370_s19 = smov [#allocation4]   ;;  %s371_s20 = smov [#allocation11]  }
  0x11   :  { %67 = dma.general %s47_s8, 768, %s49_s10, %s370_s19, %s371_s20, [#allocation12], %s269_s14, 0  }
  0x12   :  { %89 = sst [smem:[#allocation14]] %s365_s11  ;;  %s372_s21 = smov [#allocation3]  }
  0x13   :  { %91 = sst [smem:[#allocation14 + $0x1]] %s365_s11  ;;  %s82_s22 = sshll.u32 %s372_s21, 4  ;;  %s83_s22 = int_to_ptr.vmem [resolvable:$true] %s82_s22 }
  0x14   :  { %93 = sst [smem:[#allocation14 + $0x2]] %s366_s12  ;;  %s373_s23 = smov [#allocation4 + $0x1]  }
  0x15   :  { %95 = sst [smem:[#allocation14 + $0x3]] %s367_s13  ;;  %s374_s24 = smov [#allocation13]  }
  0x16   :  { %97 = sst [smem:[#allocation14 + $0x4]] %s368_s15 }
  0x17   :  { %99 = sst [smem:[#allocation14 + $0x5]] %s369_s16 }
  0x18   :  { %101 = dma.general %s81_s0, 768, %s83_s22, %s373_s23, %s374_s24, [#allocation14], %s269_s14, 0  }
  0x19   :  { %s427_s25 = sld [smem:[#allocation5]] }
  0x1a   :  { %s429_s26 = sld [smem:[#allocation5 + $0x1]] }
  0x1b   :  { %355 = dma.done.wait [#allocation4], 768 }
  0x1c   :  { %356 = vsyncadd [#allocation4], 4294966528 }
  0x1d   :  { %357 = dma.done.wait [#allocation4 + $0x1], 768 }
  0x1e   :  { %358 = vsyncadd [#allocation4 + $0x1], 4294966528  ;;  %v109_v0 = vld [vmem:[#allocation2] sm:$0xff]  ;;  %v110_v1 = vld [vmem:[#allocation2 + $0x8] sm:$0xff]  ;;  %vm181_vm3 = vcmask 7168   ;;  %s224_s4 = sshll.u32 %s455_s5, 4  ;;  %s225_s4 = int_to_ptr.hbm [resolvable:$true] %s224_s4 }
  0x1f   :  { %v111_v2 = vld [vmem:[#allocation2 + $0x10] sm:$0xff]  ;;  %v112_v3 = vld [vmem:[#allocation2 + $0x18] sm:$0xff]  ;;  %v113_v4 = vld [vmem:[#allocation2 + $0x20] sm:$0xff]  ;;  %v160_v36 = vstv %s427_s25  ;;  %s377_s16 = smov [#allocation9]  }
  0x20   :  { %v114_v5 = vld [vmem:[#allocation2 + $0x28] sm:$0xff]  ;;  %v115_v6 = vld [vmem:[#allocation3] sm:$0xff]  ;;  %v116_v7 = vld [vmem:[#allocation3 + $0x8] sm:$0xff]  ;;  %v195_v63 = vstv %s429_s26 }
  0x21   :  { %v117_v8 = vld [vmem:[#allocation3 + $0x10] sm:$0xff]  ;;  %v118_v9 = vld [vmem:[#allocation3 + $0x18] sm:$0xff]  ;;  %v119_v10 = vld [vmem:[#allocation3 + $0x20] sm:$0xff]  ;;  %v121_v12 = vadd.f32 %v115_v6, %v109_v0  ;;  %v122_v13 = vadd.f32 %v116_v7, %v110_v1 }
  0x22   :  { %v120_v11 = vld [vmem:[#allocation3 + $0x28] sm:$0xff]  ;;  %v123_v14 = vadd.f32 %v117_v8, %v111_v2  ;;  %v124_v15 = vadd.f32 %v118_v9, %v112_v3  ;;  %v133_v16 = vld [vmem:[%s452_s2] sm:$0x3f]  ;;  %v125_v21 = vadd.f32 %v119_v10, %v113_v4  ;;  %v376_v3 = vmov 8.0  }
  0x23   :  { %128 = vst [vmem:[#allocation10 + $0x8] sm:$0xff] %v122_v13  ;;  %v135_v17 = vperm.slane %v133_v16, 0  ;;  %v136_v18 = vperm.slane %v133_v16, 1  ;;  %v137_v19 = vperm.slane %v133_v16, 2  ;;  %v138_v20 = vperm.slane %v133_v16, 3  ;;  %v183_v55 = vld [vmem:[%s453_s3] sm:$0xff] }
  0x24   :  { %v126_v22 = vadd.f32 %v120_v11, %v114_v5  ;;  %129 = vst [vmem:[#allocation10 + $0x10] sm:$0xff] %v123_v14  ;;  %v139_v23 = vperm.slane %v133_v16, 4  ;;  %v140_v27 = vperm.slane %v133_v16, 5  ;;  %v192_v58 = vsub.f32 1.0, %v183_v55  ;;  %s237_s3 = sshll.u32 %s457_s7, 4  ;;  %s238_s3 = int_to_ptr.hbm [resolvable:$true] %s237_s3 }
  0x25   :  { %130 = vst [vmem:[#allocation10 + $0x18] sm:$0xff] %v124_v15  ;;  %v147_v24 = vmul.f32 %v135_v17, %v121_v12  ;;  %v148_v25 = vmul.f32 %v136_v18, %v122_v13  ;;  %v149_v26 = vmul.f32 %v137_v19, %v123_v14  ;;  %v150_v28 = vmul.f32 %v138_v20, %v124_v15 }
  0x26   :  { %131 = vst [vmem:[#allocation10 + $0x20] sm:$0xff] %v125_v21  ;;  %v151_v30 = vmul.f32 %v139_v23, %v125_v21  ;;  %v152_v32 = vmul.f32 %v140_v27, %v126_v22 }
  0x27   :  { %132 = vst [vmem:[#allocation10 + $0x28] sm:$0xff] %v126_v22  ;;  %v153_v29 = vadd.f32 %v148_v25, %v147_v24 }
  0x28   :  { %127 = vst [vmem:[#allocation10] sm:$0xff] %v121_v12 }
  0x29   :  { %v154_v31 = vadd.f32 %v153_v29, %v149_v26 }
  0x2b   :  { %v155_v33 = vadd.f32 %v154_v31, %v150_v28 }
  0x2d   :  { %v156_v34 = vadd.f32 %v155_v33, %v151_v30 }
  0x2f   :  { %v157_v35 = vadd.f32 %v156_v34, %v152_v32 }
  0x31   :  { %158 = vadd.xlane.f32.xlu0 %v157_v35 }
  0xa4   :  { %v159_v37 = vpop.xlane.xlu0 %158 }
  0xa5   :  { %v161_v38 = vadd.f32 %v160_v36, %v159_v37 }
  0xa7   :  { %v273_v39 = vmul.f32 -1.442695, %v161_v38 }
  0xa9   :  { %295 = vpow2.f32 %v273_v39 }
  0xaf   :  { %v296_v40 = vpop.eup %295 }
  0xb0   :  { %v165_v41 = vadd.f32 1.0, %v296_v40 }
  0xb2   :  { %297 = vrcp.f32 %v165_v41  ;;  %v177_v45 = vand.u32 2147483648, %v165_v41  ;;  %v175_v47 = vand.u32 2147483647, %v165_v41  ;;  %vm171_vm1 = vweird.f32 %v165_v41 }
  0xb4   :  { %v178_v49 = vor.u32 1.1754944e-38, %v177_v45  ;;  %vm176_vm4 = vcmp.eq.f32.partialorder %v175_v47, 8.507059e+37 }
  0xb8   :  { %v298_v42 = vpop.eup %297 }
  0xb9   :  { %v167_v43 = vmul.f32 %v298_v42, %v165_v41  ;;  %vm172_vm0 = vweird.f32 %v298_v42 }
  0xba   :  { %vm173_vm2 = vmor %vm171_vm1, %vm172_vm0 }
  0xbb   :  { %v168_v44 = vsub.f32 1.0, %v167_v43 }
  0xbd   :  { %v169_v46 = vmul.f32 %v298_v42, %v168_v44 }
  0xbf   :  { %v170_v48 = vadd.f32 %v298_v42, %v169_v46 }
  0xc1   :  { %v174_v50 = vsel %vm173_vm2, %v298_v42, %v170_v48 }
  0xc2   :  { %v179_v51 = vsel %vm176_vm4, %v178_v49, %v174_v50 }
  0xc3   :  { %v184_v52 = vadd.f32 1e-10, %v179_v51  ;;  %v187_v53 = vsub.f32 1.0, %v179_v51  ;;  %182 = vst.msk [vmem:[%s456_s6] sm:$0xff] %vm181_vm3, %v179_v51  ;;  %s375_s6 = smov [#allocation10]  }
  0xc4   :  { %s235_s8 = sshll.u32 %s375_s6, 4  ;;  %s236_s8 = int_to_ptr.vmem [resolvable:$true] %s235_s8 }
  0xc5   :  { %299 = vlog2.f32 %v184_v52  ;;  %v188_v54 = vadd.f32 1e-10, %v187_v53  ;;  %240 = dma.vmem_to_hbm [thread:$0]  %s236_s8, 768, %s238_s3, [#allocation6]  }
  0xc7   :  { %301 = vlog2.f32 %v188_v54 }
  0xc8   :  { %303 = vrcp.f32 %v376_v3 }
  0xcb   :  { %v300_v56 = vpop.eup %299 }
  0xcc   :  { %v186_v57 = vmul.f32 0.6931472, %v300_v56 }
  0xcd   :  { %v302_v59 = vpop.eup %301 }
  0xce   :  { %v190_v60 = vmul.f32 0.6931472, %v302_v59  ;;  %v191_v61 = vmul.f32 %v186_v57, %v183_v55  ;;  %v304_v4 = vpop.eup %303 }
  0xcf   :  { %v208_v5 = vmul.f32 8.0, %v304_v4  ;;  %vm212_vm5 = vweird.f32 %v304_v4 }
  0xd0   :  { %v193_v62 = vmul.f32 %v192_v58, %v190_v60 }
  0xd1   :  { %v209_v6 = vsub.f32 1.0, %v208_v5 }
  0xd2   :  { %v194_v0 = vadd.f32 %v193_v62, %v191_v61 }
  0xd3   :  { %v210_v10 = vmul.f32 %v304_v4, %v209_v6 }
  0xd4   :  { %v196_v1 = vmul.f32 %v195_v63, %v194_v0 }
  0xd5   :  { %v211_v13 = vadd.f32 %v304_v4, %v210_v10 }
  0xd6   :  { %v197_v2 = vsel %vm181_vm3, %v196_v1, 0.0 }
  0xd7   :  { %198 = vadd.xlane.f32.xlu0 %v197_v2  ;;  %v213_v16 = vsel %vm212_vm5, %v304_v4, %v211_v13 }
 0x14a   :  { %v199_v7 = vpop.xlane.xlu0 %198 }
 0x14b   :  { %v200_v8 = vrot.slane %v199_v7, 4 }
 0x14d   :  { %v201_v9 = vadd.f32 %v200_v8, %v199_v7 }
 0x14f   :  { %v202_v11 = vrot.slane %v201_v9, 2 }
 0x151   :  { %v203_v12 = vadd.f32 %v202_v11, %v201_v9 }
 0x153   :  { %v204_v14 = vrot.slane %v203_v12, 1 }
 0x155   :  { %v205_v15 = vadd.f32 %v204_v14, %v203_v12 }
 0x157   :  { %276 = vpush %v205_v15 }
 0x158   :  { %278 = vpush %v213_v16 }
 0x188   :  { %s277_s7 = spop %276 }
 0x189   :  { %s279_s13 = spop %278 }
 0x18a   :  { %s215_s14 = smul.f32 %s279_s13, %s277_s7 }
 0x18c   :  { %s216_s15 = ssub.f32 0.0, %s215_s14 }
 0x18e   :  { %218 = sst [smem:[#allocation9]] %s216_s15 }
 0x18f   :  { %227 = dma.smem_to_hbm %s377_s16, 16, %s225_s4, [#allocation7]  }
 0x190   :  { %359 = dma.done.wait [#allocation7], 16  }
 0x191   :  { %360 = vsyncadd [#allocation7], 4294967280 }
 0x192   :  { %361 = dma.done.wait [#allocation6], 768  }
 0x193   :  { %362 = vsyncadd [#allocation6], 4294966528 }
 0x194   :  { %251 = sfence }
 0x195   :  { %252 = vsyncpa [#allocation6], 1 }
 0x196   :  { %253 = vsyncpa [#allocation7], 1 }
 0x197   :  { %254 = vsyncpa [#allocation8], 1 }
 0x198   :  { %255 = vsyncmov [#allocation4] }
 0x19b   :  { %s256_s17 = vpop.sfrf %255 }
 0x19c   :  { %p274_p0 = scmp.ne.s32.totalorder %s256_s17, 0 }
 0x19e   :  { %260 = shalt.err (%p274_p0)  }
 0x19f   :  { %262 = vsyncmov [#allocation4 + $0x1] }
 0x1a2   :  { %s263_s5 = vpop.sfrf %262 }
 0x1a3   :  { %p275_p1 = scmp.ne.s32.totalorder %s263_s5, 0 }
 0x1a5   :  { %267 = shalt.err (%p275_p1)  }

</bundles_post_ra>
